<compile_context>
chip_gen: v7x
topology: tpu7x:2x2x1
jax: 0.10.0
libtpu: 0.0.40
codegen_flags: <defaults>
</compile_context>

<pallas_src>
import math
import functools

import jax
import jax.numpy as jnp
from jax.experimental import pallas as pl


# ----------------------------- config (ModelConfig) --------------------------
DIM = 32              # config.dim
N_HEADS = 4           # config.n_heads
HEAD_DIM = DIM // N_HEADS
BATCH = 2
SEQ = 8


# ----------------------------- kernel ----------------------------------------
def attention_kernel(batch, n_heads,
                     x_all_ref, w_all_ref, b_all_ref, bias_ref,
                     wo_ref, bo_ref, out_ref):
    """Whole batch in ONE invocation (no grid).

    With G = batch * n_heads and group ordering g = h * batch + b:
      x_all : (3G, S, D)   q/k/v inputs, replicated over heads
      w_all : (3G, hd, D)  per-head projection weights (q pre-scaled)
      b_all : (3G, 1, hd)  per-head projection biases  (q pre-scaled)
      bias  : (G, S, S)    additive mask bias (0 / -1e9)
      wo    : (G, hd, D)   per-head output-projection weight blocks
      bo    : (1, D)
      out   : (B, S, D)
    """
    f32 = jnp.float32
    B, H = batch, n_heads
    G = B * H

    # Fused q/k/v projection for every (head, batch) pair in ONE batched MXU
    # contraction. 1/sqrt(head_dim) is already folded into the q weights/bias.
    proj = jnp.einsum('gsd,ged->gse', x_all_ref[...], w_all_ref[...],
                      preferred_element_type=f32) + b_all_ref[...]      # (3G,S,hd)
    qh = proj[0 * G:1 * G]                                              # (G,S,hd)
    kh = proj[1 * G:2 * G]
    vh = proj[2 * G:3 * G]

    # Attention, batched over G = B*H.  The additive -1e9 bias is applied to
    # already-scaled scores; equivalent to masked_fill(mask==0, -1e9) for
    # softmax as long as no row is fully masked.
    scores = jnp.einsum('gqd,gkd->gqk', qh, kh,
                        preferred_element_type=f32) + bias_ref[...]     # (G,S,S)
    m = jnp.max(scores, axis=-1, keepdims=True)
    p = jnp.exp(scores - m)
    probs = p / jnp.sum(p, axis=-1, keepdims=True)
    # nn.Dropout(attn probs) is identity in eval mode.
    ctx = jnp.einsum('gqk,gkd->gqd', probs, vh,
                     preferred_element_type=f32)                        # (G,S,hd)

    # Output projection with the head-concat folded into per-head weight
    # blocks; head reduction = H-1 adds over leading-dim slices (no reshape).
    partial = jnp.einsum('gqd,gde->gqe', ctx, wo_ref[...],
                         preferred_element_type=f32)                    # (G,S,D)
    acc = partial[0:B]
    for h in range(1, H):
        acc = acc + partial[h * B:(h + 1) * B]
    out_ref[...] = (acc + bo_ref[...]).astype(out_ref.dtype)            # (B,S,D)


# ----------------------------- wrapper -----------------------------------------
@jax.jit
def attention_forward(packed, q, k, v, mask=None):
    B, S, D = q.shape
    _, H, hd, _ = packed['w_qkv_h'].shape
    G = B * H

    if mask is None:
        mask_bias = jnp.zeros((B, S, S), jnp.float32)
    else:
        mask_bias = jnp.where(mask.reshape(B, S, S) == 0,
                              jnp.float32(-1e9), jnp.float32(0.0))

    # Per-call layout plumbing on the XLA side (fused under jit); the kernel
    # receives ready-to-use head-batched operands and does zero relayout.
    x_stack = jnp.stack([q, k, v], axis=0)                               # (3,B,S,D)
    x_all = jnp.broadcast_to(x_stack[:, None],
                             (3, H, B, S, D)).reshape(3 * G, S, D)
    w_all = jnp.broadcast_to(packed['w_qkv_h'][:, :, None],
                             (3, H, B, hd, D)).reshape(3 * G, hd, D)
    b_all = jnp.broadcast_to(packed['b_qkv_h'][:, :, None],
                             (3, H, B, 1, hd)).reshape(3 * G, 1, hd)
    bias_g = jnp.broadcast_to(mask_bias[None], (H, B, S, S)).reshape(G, S, S)
    wo_g = jnp.broadcast_to(packed['wo_h'][:, None],
                            (H, B, hd, D)).reshape(G, hd, D)

    kernel = functools.partial(attention_kernel, B, H)
    return pl.pallas_call(
        kernel,
        out_shape=jax.ShapeDtypeStruct((B, S, D), q.dtype),
    )(x_all, w_all, b_all, bias_g, wo_g, packed['bo'])


# ----------------------------- params ------------------------------------------
def init_raw_params(key):
    """Torch-equivalent weights: nn.Linear stored pre-transposed to [in, out]."""
    def nrm(k, shape, scale=0.2):
        return (scale * jax.random.normal(k, shape)).astype(jnp.float32)
    ks = jax.random.split(key, 8)
    return {
        'wq': nrm(ks[0], (DIM, DIM)), 'bq': nrm(ks[1], (DIM,)),
        'wk': nrm(ks[2], (DIM, DIM)), 'bk': nrm(ks[3], (DIM,)),
        'wv': nrm(ks[4], (DIM, DIM)), 'bv': nrm(ks[5], (DIM,)),
        'wo': nrm(ks[6], (DIM, DIM)), 'bo': nrm(ks[7], (DIM,)),
    }


def pack_params(raw):
    """One-time repack: per-head weight blocks, q scale folded in."""
    H, hd, D = N_HEADS, HEAD_DIM, DIM
    scale = 1.0 / math.sqrt(hd)

    def per_head_w(w):     # (D,D) -> (H,hd,D): [h,e,d] = w[d, h*hd+e]
        return w.reshape(D, H, hd).transpose(1, 2, 0)

    def per_head_b(b):     # (D,)  -> (H,1,hd): [h,0,e] = b[h*hd+e]
        return b.reshape(H, 1, hd)

    return {
        'w_qkv_h': jnp.stack([per_head_w(raw['wq']) * scale,
                              per_head_w(raw['wk']),
                              per_head_w(raw['wv'])], axis=0),   # (3,H,hd,D)
        'b_qkv_h': jnp.stack([per_head_b(raw['bq']) * scale,
                              per_head_b(raw['bk']),
                              per_head_b(raw['bv'])], axis=0),   # (3,H,1,hd)
        'wo_h': raw['wo'].reshape(H, hd, D),                     # (H,hd,D)
        'bo': raw['bo'][None, :],                                # (1,D)
    }


# ----------------------------- pure-JAX reference --------------------------------
def attention_reference(raw, q, k, v, mask):
    B, S, D = q.shape
    H, hd = N_HEADS, HEAD_DIM
    qp = q @ raw['wq'] + raw['bq']
    kp = k @ raw['wk'] + raw['bk']
    vp = v @ raw['wv'] + raw['bv']

    def split(x):
        return x.reshape(B, S, H, hd).transpose(0, 2, 1, 3)   # (B,H,S,hd)

    qh, kh, vh = split(qp), split(kp), split(vp)
    scores = jnp.einsum('bhqd,bhkd->bhqk', qh, kh) / math.sqrt(hd)
    scores = jnp.where(mask.reshape(B, 1, S, S) == 0, -1e9, scores)
    probs = jax.nn.softmax(scores, axis=-1)
    ctx = jnp.einsum('bhqk,bhkd->bhqd', probs, vh)
    concat = ctx.transpose(0, 2, 1, 3).reshape(B, S, D)
    return concat @ raw['wo'] + raw['bo']


# ----------------------------- main -----------------------------------------------
if __name__ == "__main__":
    root = jax.random.PRNGKey(0)
    key_par, key_q, key_k, key_v = jax.random.split(root, 4)

    raw = init_raw_params(key_par)
    packed = pack_params(raw)

    q = jax.random.normal(key_q, (BATCH, SEQ, DIM), jnp.float32)
    k = jax.random.normal(key_k, (BATCH, SEQ, DIM), jnp.float32)
    v = jax.random.normal(key_v, (BATCH, SEQ, DIM), jnp.float32)

    # Padding mask (broadcast over heads), torch semantics: mask==0 -> -1e9.
    # Last two key positions of batch element 1 are padded out.
    mask = jnp.ones((BATCH, 1, SEQ, SEQ), jnp.float32)
    mask = mask.at[1, :, :, SEQ - 2:].set(0.0)

    out = attention_forward(packed, q, k, v, mask)
    jax.block_until_ready(out)

    assert out.shape == (BATCH, SEQ, DIM)
    assert bool(jnp.all(jnp.isfinite(out)))

    ref = attention_reference(raw, q, k, v, mask)
    max_err = float(jnp.max(jnp.abs(out - ref)))
    # All-f32 kernel with exact softmax division -> tight tolerance.
    assert max_err < 1e-4, f"max abs err vs reference = {max_err}"

    print("KERNEL_OK")
</pallas_src>

<mosaic_0001>
module attributes {stable_mosaic.version = 11 : i64} {
  func.func @attention_kernel(%arg0: memref<24x8x32xf32, #tpu.memory_space<vmem>>, %arg1: memref<24x8x32xf32, #tpu.memory_space<vmem>>, %arg2: memref<24x1x8xf32, #tpu.memory_space<vmem>>, %arg3: memref<8x8x8xf32, #tpu.memory_space<vmem>>, %arg4: memref<8x8x32xf32, #tpu.memory_space<vmem>>, %arg5: memref<1x32xf32, #tpu.memory_space<vmem>>, %arg6: memref<2x8x32xf32, #tpu.memory_space<vmem>>) attributes {dimension_semantics = [], scalar_prefetch = 0 : i64, scratch_operands = 0 : i64, tpu.core_type = #tpu.core_type<tc>} {
    %c0 = arith.constant 0 : index
    %c0_0 = arith.constant 0 : index
    %c0_1 = arith.constant 0 : index
    %0 = vector.load %arg0[%c0, %c0_0, %c0_1] : memref<24x8x32xf32, #tpu.memory_space<vmem>>, vector<24x8x32xf32>
    %c0_2 = arith.constant 0 : index
    %c0_3 = arith.constant 0 : index
    %c0_4 = arith.constant 0 : index
    %1 = vector.load %arg1[%c0_2, %c0_3, %c0_4] : memref<24x8x32xf32, #tpu.memory_space<vmem>>, vector<24x8x32xf32>
    "tpu.trace_start"() <{level = 10 : i32, message = "gsd,ged->gse"}> : () -> ()
    %cst = arith.constant dense<0.000000e+00> : vector<24x8x8xf32>
    %2 = tpu.matmul %0, %1, %cst {dimension_numbers = #tpu.dot_dimension_numbers<[2], [2], [1], [1], [0, 0, 0, 1, 1, 1], [0], [0]>} : vector<24x8x32xf32>, vector<24x8x32xf32>, vector<24x8x8xf32> -> vector<24x8x8xf32>
    "tpu.trace_stop"() : () -> ()
    %c0_5 = arith.constant 0 : index
    %c0_6 = arith.constant 0 : index
    %c0_7 = arith.constant 0 : index
    %3 = vector.load %arg2[%c0_5, %c0_6, %c0_7] : memref<24x1x8xf32, #tpu.memory_space<vmem>>, vector<24x1x8xf32>
    %4 = vector.broadcast %3 : vector<24x1x8xf32> to vector<24x8x8xf32>
    %5 = arith.addf %2, %4 : vector<24x8x8xf32>
    %6 = vector.extract_strided_slice %5 {offsets = [0, 0, 0], sizes = [8, 8, 8], strides = [1, 1, 1]} : vector<24x8x8xf32> to vector<8x8x8xf32>
    %7 = vector.extract_strided_slice %5 {offsets = [8, 0, 0], sizes = [8, 8, 8], strides = [1, 1, 1]} : vector<24x8x8xf32> to vector<8x8x8xf32>
    %8 = vector.extract_strided_slice %5 {offsets = [16, 0, 0], sizes = [8, 8, 8], strides = [1, 1, 1]} : vector<24x8x8xf32> to vector<8x8x8xf32>
    "tpu.trace_start"() <{level = 10 : i32, message = "gqd,gkd->gqk"}> : () -> ()
    %cst_8 = arith.constant dense<0.000000e+00> : vector<8x8x8xf32>
    %9 = tpu.matmul %6, %7, %cst_8 {dimension_numbers = #tpu.dot_dimension_numbers<[2], [2], [1], [1], [0, 0, 0, 1, 1, 1], [0], [0]>} : vector<8x8x8xf32>, vector<8x8x8xf32>, vector<8x8x8xf32> -> vector<8x8x8xf32>
    "tpu.trace_stop"() : () -> ()
    %c0_9 = arith.constant 0 : index
    %c0_10 = arith.constant 0 : index
    %c0_11 = arith.constant 0 : index
    %10 = vector.load %arg3[%c0_9, %c0_10, %c0_11] : memref<8x8x8xf32, #tpu.memory_space<vmem>>, vector<8x8x8xf32>
    %11 = arith.addf %9, %10 : vector<8x8x8xf32>
    %cst_12 = arith.constant dense<0xFF800000> : vector<8x8xf32>
    %12 = vector.multi_reduction <maximumf>, %11, %cst_12 [2] : vector<8x8x8xf32> to vector<8x8xf32>
    %13 = vector.shape_cast %12 : vector<8x8xf32> to vector<8x8x1xf32>
    %14 = vector.broadcast %13 : vector<8x8x1xf32> to vector<8x8x8xf32>
    %15 = arith.subf %11, %14 : vector<8x8x8xf32>
    %16 = math.exp %15 : vector<8x8x8xf32>
    %cst_13 = arith.constant dense<0.000000e+00> : vector<8x8xf32>
    %17 = vector.multi_reduction <add>, %16, %cst_13 [2] : vector<8x8x8xf32> to vector<8x8xf32>
    %18 = vector.shape_cast %17 : vector<8x8xf32> to vector<8x8x1xf32>
    %19 = vector.broadcast %18 : vector<8x8x1xf32> to vector<8x8x8xf32>
    %20 = arith.divf %16, %19 : vector<8x8x8xf32>
    "tpu.trace_start"() <{level = 10 : i32, message = "gqk,gkd->gqd"}> : () -> ()
    %cst_14 = arith.constant dense<0.000000e+00> : vector<8x8x8xf32>
    %21 = tpu.matmul %20, %8, %cst_14 {dimension_numbers = #tpu.dot_dimension_numbers<[2], [1], [1], [2], [0, 0, 0, 1, 1, 2], [0], [0]>} : vector<8x8x8xf32>, vector<8x8x8xf32>, vector<8x8x8xf32> -> vector<8x8x8xf32>
    "tpu.trace_stop"() : () -> ()
    %c0_15 = arith.constant 0 : index
    %c0_16 = arith.constant 0 : index
    %c0_17 = arith.constant 0 : index
    %22 = vector.load %arg4[%c0_15, %c0_16, %c0_17] : memref<8x8x32xf32, #tpu.memory_space<vmem>>, vector<8x8x32xf32>
    "tpu.trace_start"() <{level = 10 : i32, message = "gqd,gde->gqe"}> : () -> ()
    %cst_18 = arith.constant dense<0.000000e+00> : vector<8x8x32xf32>
    %23 = tpu.matmul %21, %22, %cst_18 {dimension_numbers = #tpu.dot_dimension_numbers<[2], [1], [1], [2], [0, 0, 0, 1, 1, 2], [0], [0]>} : vector<8x8x8xf32>, vector<8x8x32xf32>, vector<8x8x32xf32> -> vector<8x8x32xf32>
    "tpu.trace_stop"() : () -> ()
    %24 = vector.extract_strided_slice %23 {offsets = [0, 0, 0], sizes = [2, 8, 32], strides = [1, 1, 1]} : vector<8x8x32xf32> to vector<2x8x32xf32>
    %25 = vector.extract_strided_slice %23 {offsets = [2, 0, 0], sizes = [2, 8, 32], strides = [1, 1, 1]} : vector<8x8x32xf32> to vector<2x8x32xf32>
    %26 = arith.addf %24, %25 : vector<2x8x32xf32>
    %27 = vector.extract_strided_slice %23 {offsets = [4, 0, 0], sizes = [2, 8, 32], strides = [1, 1, 1]} : vector<8x8x32xf32> to vector<2x8x32xf32>
    %28 = arith.addf %26, %27 : vector<2x8x32xf32>
    %29 = vector.extract_strided_slice %23 {offsets = [6, 0, 0], sizes = [2, 8, 32], strides = [1, 1, 1]} : vector<8x8x32xf32> to vector<2x8x32xf32>
    %30 = arith.addf %28, %29 : vector<2x8x32xf32>
    %c0_19 = arith.constant 0 : index
    %c0_20 = arith.constant 0 : index
    %31 = vector.load %arg5[%c0_19, %c0_20] : memref<1x32xf32, #tpu.memory_space<vmem>>, vector<1x32xf32>
    %32 = vector.shape_cast %31 : vector<1x32xf32> to vector<1x1x32xf32>
    %33 = vector.broadcast %32 : vector<1x1x32xf32> to vector<2x8x32xf32>
    %34 = arith.addf %30, %33 : vector<2x8x32xf32>
    %c0_21 = arith.constant 0 : index
    %c0_22 = arith.constant 0 : index
    %c0_23 = arith.constant 0 : index
    %35 = vector.load %arg6[%c0_21, %c0_22, %c0_23] : memref<2x8x32xf32, #tpu.memory_space<vmem>>, vector<2x8x32xf32>
    tpu.vector_store %arg6[%c0_21, %c0_22, %c0_23], %34 {strides = array<i32>} : memref<2x8x32xf32, #tpu.memory_space<vmem>>, vector<2x8x32xf32>,
    return
  }
}

</mosaic_0001>

<bundles_post_ra>
// kernel: attention_forward.1
= control target key start
LH: loop header
LB: loop body
LE: loop exit
PB: predicated region body
PF: predicated region fallthrough
CT: control target
= control target key end

     0   :  { %vm240_vm0 = vcmask 261120   ;;  %v4481_v2 = vmov 0.0   ;;  %vm4482_vm1 = vmmov 0   ;;  %s5078_s0 = inlined_call_operand.vmem [shape: f32[24,8,32], index: 0, kind: input, shape index: {}]   ;;  %s5079_s1 = inlined_call_operand.vmem [shape: f32[24,8,32], index: 1, kind: input, shape index: {}]   ;;  %s5080_s2 = inlined_call_operand.vmem [shape: f32[24,1,8], index: 2, kind: input, shape index: {}]   ;;  %s5081_s3 = inlined_call_operand.vmem [shape: f32[8,8,8], index: 3, kind: input, shape index: {}]   ;;  %s5082_s4 = inlined_call_operand.vmem [shape: f32[8,8,32], index: 4, kind: input, shape index: {}]   ;;  %s5083_s5 = inlined_call_operand.vmem [shape: f32[1,32], index: 5, kind: input, shape index: {}]   ;;  %s5084_s6 = inlined_call_operand.hbm [shape: f32[2,8,32], index: 6, kind: output, shape index: {}]  }
   0x1   :  { %v48_v0 = vld [vmem:[%s5079_s1] sm:$0xff]  ;;  %v49_v1 = vld [vmem:[%s5079_s1 + $0x8] sm:$0xff]  ;;  %4180 = vmatprep.subr.mxu0 %v4481_v2  ;;  %4185 = vmatprep.subr.mxu1 %v4481_v2  ;;  %v50_v5 = vld [vmem:[%s5079_s1 + $0x10] sm:$0xff] }
   0x2   :  { %4181 = vmatpush3.xpose.msk.msra.mxu0 %vm240_vm0, %v48_v0  ;;  %4186 = vmatpush3.xpose.msk.msra.mxu1 %vm240_vm0, %v49_v1  ;;  %v24_v3 = vld [vmem:[%s5078_s0] sm:$0xff]  ;;  %v25_v4 = vld [vmem:[%s5078_s0 + $0x8] sm:$0xff]  ;;  %v51_v6 = vld [vmem:[%s5079_s1 + $0x18] sm:$0xff] }
   0x3   :  { %4182 = vmatprep.mubr.msk.f32.mxu0 %vm4482_vm1, %v4481_v2  ;;  %4187 = vmatprep.mubr.msk.f32.mxu1 %vm4482_vm1, %v4481_v2  ;;  %v26_v7 = vld [vmem:[%s5078_s0 + $0x10] sm:$0xff]  ;;  %v27_v8 = vld [vmem:[%s5078_s0 + $0x18] sm:$0xff]  ;;  %v52_v9 = vld [vmem:[%s5079_s1 + $0x20] sm:$0xff] }
   0x4   :  { %4190 = vmatprep.subr.mxu0 %v4481_v2  ;;  %4195 = vmatprep.subr.mxu1 %v4481_v2  ;;  %v53_v10 = vld [vmem:[%s5079_s1 + $0x28] sm:$0xff]  ;;  %v28_v11 = vld [vmem:[%s5078_s0 + $0x20] sm:$0xff]  ;;  %v54_v13 = vld [vmem:[%s5079_s1 + $0x30] sm:$0xff] }
   0x5   :  { %4183 = vmatmul.mubr.msk.f32.vlgmr.msra.gmra.mrb[0].mxu0 %vm240_vm0, %v24_v3  ;;  %4188 = vmatmul.mubr.msk.f32.vlgmr.msra.gmra.mrb[0].mxu1 %vm240_vm0, %v25_v4  ;;  %v29_v12 = vld [vmem:[%s5078_s0 + $0x28] sm:$0xff]  ;;  %v55_v14 = vld [vmem:[%s5079_s1 + $0x38] sm:$0xff] }
   0x6   :  { %4191 = vmatpush3.xpose.msk.msra.mxu0 %vm240_vm0, %v50_v5  ;;  %4196 = vmatpush3.xpose.msk.msra.mxu1 %vm240_vm0, %v51_v6 }
   0x7   :  { %4192 = vmatprep.mubr.msk.f32.mxu0 %vm4482_vm1, %v4481_v2  ;;  %4197 = vmatprep.mubr.msk.f32.mxu1 %vm4482_vm1, %v4481_v2 }
   0x8   :  { %4200 = vmatprep.subr.mxu0 %v4481_v2  ;;  %4205 = vmatprep.subr.mxu1 %v4481_v2 }
   0x9   :  { %4193 = vmatmul.mubr.msk.f32.vlgmr.msra.gmra.mrb[2].mxu0 %vm240_vm0, %v26_v7  ;;  %4198 = vmatmul.mubr.msk.f32.vlgmr.msra.gmra.mrb[2].mxu1 %vm240_vm0, %v27_v8 }
   0xa   :  { %4201 = vmatpush3.xpose.msk.msra.mxu0 %vm240_vm0, %v52_v9  ;;  %4206 = vmatpush3.xpose.msk.msra.mxu1 %vm240_vm0, %v53_v10 }
   0xb   :  { %4202 = vmatprep.mubr.msk.f32.mxu0 %vm4482_vm1, %v4481_v2  ;;  %4207 = vmatprep.mubr.msk.f32.mxu1 %vm4482_vm1, %v4481_v2 }
   0xc   :  { %11 = vsyncpa [#allocation3], 0  ;;  %4210 = vmatprep.subr.mxu0 %v4481_v2  ;;  %4215 = vmatprep.subr.mxu1 %v4481_v2  ;;  %v30_v15 = vld [vmem:[%s5078_s0 + $0x30] sm:$0xff]  ;;  %v31_v16 = vld [vmem:[%s5078_s0 + $0x38] sm:$0xff]  ;;  %vm2073_vm2 = vcmask 64512  }
   0xd   :  { %4203 = vmatmul.mubr.msk.f32.vlgmr.msra.gmra.mrb[4].mxu0 %vm240_vm0, %v28_v11  ;;  %4208 = vmatmul.mubr.msk.f32.vlgmr.msra.gmra.mrb[4].mxu1 %vm240_vm0, %v29_v12  ;;  %v56_v17 = vld [vmem:[%s5079_s1 + $0x40] sm:$0xff]  ;;  %v57_v18 = vld [vmem:[%s5079_s1 + $0x48] sm:$0xff]  ;;  %v58_v21 = vld [vmem:[%s5079_s1 + $0x50] sm:$0xff] }
   0xe   :  { %4211 = vmatpush3.xpose.msk.msra.mxu0 %vm240_vm0, %v54_v13  ;;  %4216 = vmatpush3.xpose.msk.msra.mxu1 %vm240_vm0, %v55_v14  ;;  %v32_v19 = vld [vmem:[%s5078_s0 + $0x40] sm:$0xff]  ;;  %v33_v20 = vld [vmem:[%s5078_s0 + $0x48] sm:$0xff]  ;;  %v59_v22 = vld [vmem:[%s5079_s1 + $0x58] sm:$0xff] }
   0xf   :  { %4212 = vmatprep.mubr.msk.f32.mxu0 %vm4482_vm1, %v4481_v2  ;;  %4217 = vmatprep.mubr.msk.f32.mxu1 %vm4482_vm1, %v4481_v2  ;;  %v34_v23 = vld [vmem:[%s5078_s0 + $0x50] sm:$0xff]  ;;  %v35_v24 = vld [vmem:[%s5078_s0 + $0x58] sm:$0xff]  ;;  %v60_v25 = vld [vmem:[%s5079_s1 + $0x60] sm:$0xff] }
  0x10   :  { %4220 = vmatprep.subr.mxu0 %v4481_v2  ;;  %4225 = vmatprep.subr.mxu1 %v4481_v2  ;;  %v61_v26 = vld [vmem:[%s5079_s1 + $0x68] sm:$0xff]  ;;  %v36_v27 = vld [vmem:[%s5078_s0 + $0x60] sm:$0xff]  ;;  %v62_v29 = vld [vmem:[%s5079_s1 + $0x70] sm:$0xff] }
  0x11   :  { %4213 = vmatmul.mubr.msk.f32.vlgmr.msra.gmra.mrb[6].mxu0 %vm240_vm0, %v30_v15  ;;  %4218 = vmatmul.mubr.msk.f32.vlgmr.msra.gmra.mrb[6].mxu1 %vm240_vm0, %v31_v16  ;;  %v37_v28 = vld [vmem:[%s5078_s0 + $0x68] sm:$0xff]  ;;  %v63_v30 = vld [vmem:[%s5079_s1 + $0x78] sm:$0xff]  ;;  %v38_v31 = vld [vmem:[%s5078_s0 + $0x70] sm:$0xff] }
  0x12   :  { %4221 = vmatpush3.xpose.msk.msra.mxu0 %vm240_vm0, %v56_v17  ;;  %4226 = vmatpush3.xpose.msk.msra.mxu1 %vm240_vm0, %v57_v18  ;;  %v39_v32 = vld [vmem:[%s5078_s0 + $0x78] sm:$0xff]  ;;  %v64_v33 = vld [vmem:[%s5079_s1 + $0x80] sm:$0xff]  ;;  %v65_v34 = vld [vmem:[%s5079_s1 + $0x88] sm:$0xff] }
  0x13   :  { %4222 = vmatprep.mubr.msk.f32.mxu0 %vm4482_vm1, %v4481_v2  ;;  %4227 = vmatprep.mubr.msk.f32.mxu1 %vm4482_vm1, %v4481_v2  ;;  %v40_v35 = vld [vmem:[%s5078_s0 + $0x80] sm:$0xff]  ;;  %v41_v36 = vld [vmem:[%s5078_s0 + $0x88] sm:$0xff]  ;;  %v66_v37 = vld [vmem:[%s5079_s1 + $0x90] sm:$0xff] }
  0x14   :  { %4230 = vmatprep.subr.mxu0 %v4481_v2  ;;  %4235 = vmatprep.subr.mxu1 %v4481_v2  ;;  %v67_v38 = vld [vmem:[%s5079_s1 + $0x98] sm:$0xff]  ;;  %v42_v39 = vld [vmem:[%s5078_s0 + $0x90] sm:$0xff]  ;;  %v68_v41 = vld [vmem:[%s5079_s1 + $0xa0] sm:$0xff] }
  0x15   :  { %4223 = vmatmul.mubr.msk.f32.vlgmr.msra.gmra.mrb[8].mxu0 %vm240_vm0, %v32_v19  ;;  %4228 = vmatmul.mubr.msk.f32.vlgmr.msra.gmra.mrb[8].mxu1 %vm240_vm0, %v33_v20  ;;  %v43_v40 = vld [vmem:[%s5078_s0 + $0x98] sm:$0xff]  ;;  %v69_v42 = vld [vmem:[%s5079_s1 + $0xa8] sm:$0xff]  ;;  %v44_v43 = vld [vmem:[%s5078_s0 + $0xa0] sm:$0xff] }
  0x16   :  { %4231 = vmatpush3.xpose.msk.msra.mxu0 %vm240_vm0, %v58_v21  ;;  %4236 = vmatpush3.xpose.msk.msra.mxu1 %vm240_vm0, %v59_v22  ;;  %v45_v44 = vld [vmem:[%s5078_s0 + $0xa8] sm:$0xff]  ;;  %v70_v45 = vld [vmem:[%s5079_s1 + $0xb0] sm:$0xff]  ;;  %v71_v46 = vld [vmem:[%s5079_s1 + $0xb8] sm:$0xff] }
  0x17   :  { %4232 = vmatprep.mubr.msk.f32.mxu0 %vm4482_vm1, %v4481_v2  ;;  %4237 = vmatprep.mubr.msk.f32.mxu1 %vm4482_vm1, %v4481_v2  ;;  %v46_v47 = vld [vmem:[%s5078_s0 + $0xb0] sm:$0xff]  ;;  %v47_v48 = vld [vmem:[%s5078_s0 + $0xb8] sm:$0xff]  ;;  %v3987_v1 = vld [vmem:[%s5080_s2 + $0x8] ss:$0 sm:$0xff]  ;;  %s4483_s0 = smov [#allocation2]  }
  0x18   :  { %4240 = vmatprep.subr.mxu0 %v4481_v2  ;;  %4245 = vmatprep.subr.mxu1 %v4481_v2  ;;  %v3988_v3 = vld [vmem:[%s5080_s2 + $0x9] ss:$0 sm:$0xff]  ;;  %v3979_v6 = vld [vmem:[%s5080_s2] ss:$0 sm:$0xff]  ;;  %v3980_v7 = vld [vmem:[%s5080_s2 + $0x1] ss:$0 sm:$0xff] }
  0x19   :  { %4233 = vmatmul.mubr.msk.f32.vlgmr.msra.gmra.mrb[10].mxu0 %vm240_vm0, %v34_v23  ;;  %4238 = vmatmul.mubr.msk.f32.vlgmr.msra.gmra.mrb[10].mxu1 %vm240_vm0, %v35_v24  ;;  %v3989_v12 = vld [vmem:[%s5080_s2 + $0xa] ss:$0 sm:$0xff]  ;;  %v3990_v13 = vld [vmem:[%s5080_s2 + $0xb] ss:$0 sm:$0xff]  ;;  %v3981_v18 = vld [vmem:[%s5080_s2 + $0x2] ss:$0 sm:$0xff] }
  0x1a   :  { %4241 = vmatpush3.xpose.msk.msra.mxu0 %vm240_vm0, %v60_v25  ;;  %4246 = vmatpush3.xpose.msk.msra.mxu1 %vm240_vm0, %v61_v26  ;;  %v3982_v19 = vld [vmem:[%s5080_s2 + $0x3] ss:$0 sm:$0xff]  ;;  %v3991_v24 = vld [vmem:[%s5080_s2 + $0xc] ss:$0 sm:$0xff]  ;;  %v3992_v25 = vld [vmem:[%s5080_s2 + $0xd] ss:$0 sm:$0xff] }
  0x1b   :  { %4242 = vmatprep.mubr.msk.f32.mxu0 %vm4482_vm1, %v4481_v2  ;;  %4247 = vmatprep.mubr.msk.f32.mxu1 %vm4482_vm1, %v4481_v2  ;;  %s3968_s1 = sshll.u32 %s4483_s0, 4  ;;  %s3969_s1 = int_to_ptr.vmem [resolvable:$true] %s3968_s1 }
  0x1c   :  { %4250 = vmatprep.subr.mxu0 %v4481_v2  ;;  %4255 = vmatprep.subr.mxu1 %v4481_v2  ;;  %s4457_s21 = scalar_lea.vmem %s3969_s1, 256  ;;  %p4462_p1 = scmp.lt.s32.totalorder %s3969_s1, %s3969_s1 }
  0x1d   :  { %4243 = vmatmul.mubr.msk.f32.vlgmr.msra.gmra.mrb[12].mxu0 %vm240_vm0, %v36_v27  ;;  %4248 = vmatmul.mubr.msk.f32.vlgmr.msra.gmra.mrb[12].mxu1 %vm240_vm0, %v37_v28  ;;  %p4458_p0 = scmp.ne.s32.totalorder %s3969_s1, %s4457_s21  ;;  %p4463_p2 = scmp.lt.s32.totalorder %s4457_s21, %s4457_s21 }
  0x1e   :  { %4251 = vmatpush3.xpose.msk.msra.mxu0 %vm240_vm0, %v62_v29  ;;  %4256 = vmatpush3.xpose.msk.msra.mxu1 %vm240_vm0, %v63_v30  ;;  %v3983_v30 = vld [vmem:[%s5080_s2 + $0x4] ss:$0 sm:$0xff] }
  0x1f   :  { %4252 = vmatprep.mubr.msk.f32.mxu0 %vm4482_vm1, %v4481_v2  ;;  %4257 = vmatprep.mubr.msk.f32.mxu1 %vm4482_vm1, %v4481_v2  ;;  %p4464_p3 = por %p4463_p2, %p4462_p1 }
  0x20   :  { %4260 = vmatprep.subr.mxu0 %v4481_v2  ;;  %4265 = vmatprep.subr.mxu1 %v4481_v2 }
  0x21   :  { %4253 = vmatmul.mubr.msk.f32.vlgmr.msra.gmra.mrb[14].mxu0 %vm240_vm0, %v38_v31  ;;  %4258 = vmatmul.mubr.msk.f32.vlgmr.msra.gmra.mrb[14].mxu1 %vm240_vm0, %v39_v32  ;;  %v3984_v31 = vld [vmem:[%s5080_s2 + $0x5] ss:$0 sm:$0xff]  ;;  %p4465_p4 = pnand %p4464_p3, %p4458_p0 }
  0x22   :  { %4262 = vmatprep.mubr.msk.f32.mxu0 %vm4482_vm1, %v4481_v2  ;;  %4267 = vmatprep.mubr.msk.f32.mxu1 %vm4482_vm1, %v4481_v2 }
  0x23   :  { %4261 = vmatpush3.xpose.msk.msra.mxu0 %vm240_vm0, %v64_v33  ;;  %4266 = vmatpush3.xpose.msk.msra.mxu1 %vm240_vm0, %v65_v34 }
  0x24   :  { %4270 = vmatprep.subr.mxu0 %v4481_v2  ;;  %4275 = vmatprep.subr.mxu1 %v4481_v2 }
  0x26   :  { %4263 = vmatmul.mubr.msk.f32.vlgmr.msra.gmra.mrb[16].mxu0 %vm240_vm0, %v40_v35  ;;  %4268 = vmatmul.mubr.msk.f32.vlgmr.msra.gmra.mrb[16].mxu1 %vm240_vm0, %v41_v36  ;;  %v3993_v36 = vld [vmem:[%s5080_s2 + $0xe] ss:$0 sm:$0xff] }
  0x27   :  { %4271 = vmatpush3.xpose.msk.msra.mxu0 %vm240_vm0, %v66_v37  ;;  %4276 = vmatpush3.xpose.msk.msra.mxu1 %vm240_vm0, %v67_v38  ;;  %v3994_v37 = vld [vmem:[%s5080_s2 + $0xf] ss:$0 sm:$0xff] }
  0x28   :  { %4272 = vmatprep.mubr.msk.f32.mxu0 %vm4482_vm1, %v4481_v2  ;;  %4277 = vmatprep.mubr.msk.f32.mxu1 %vm4482_vm1, %v4481_v2 }
  0x29   :  { %4280 = vmatprep.subr.mxu0 %v4481_v2  ;;  %4285 = vmatprep.subr.mxu1 %v4481_v2 }
  0x2a   :  { %4273 = vmatmul.mubr.msk.f32.vlgmr.msra.gmra.mrb[18].mxu0 %vm240_vm0, %v42_v39  ;;  %4278 = vmatmul.mubr.msk.f32.vlgmr.msra.gmra.mrb[18].mxu1 %vm240_vm0, %v43_v40 }
  0x2b   :  { %4281 = vmatpush3.xpose.msk.msra.mxu0 %vm240_vm0, %v68_v41  ;;  %4286 = vmatpush3.xpose.msk.msra.mxu1 %vm240_vm0, %v69_v42  ;;  %v3985_v42 = vld [vmem:[%s5080_s2 + $0x6] ss:$0 sm:$0xff] }
  0x2c   :  { %4282 = vmatprep.mubr.msk.f32.mxu0 %vm4482_vm1, %v4481_v2  ;;  %4287 = vmatprep.mubr.msk.f32.mxu1 %vm4482_vm1, %v4481_v2 }
  0x2d   :  { %4290 = vmatprep.subr.mxu0 %v4481_v2  ;;  %4295 = vmatprep.subr.mxu1 %v4481_v2 }
  0x2e   :  { %4283 = vmatmul.mubr.msk.f32.vlgmr.msra.gmra.mrb[20].mxu0 %vm240_vm0, %v44_v43  ;;  %4288 = vmatmul.mubr.msk.f32.vlgmr.msra.gmra.mrb[20].mxu1 %vm240_vm0, %v45_v44  ;;  %v3986_v43 = vld [vmem:[%s5080_s2 + $0x7] ss:$0 sm:$0xff] }
  0x2f   :  { %4291 = vmatpush3.xpose.msk.msra.mxu0 %vm240_vm0, %v70_v45  ;;  %4296 = vmatpush3.xpose.msk.msra.mxu1 %vm240_vm0, %v71_v46 }
  0x30   :  { %4292 = vmatprep.mubr.msk.f32.mxu0 %vm4482_vm1, %v4481_v2  ;;  %4297 = vmatprep.mubr.msk.f32.mxu1 %vm4482_vm1, %v4481_v2 }
  0x31   :  { %4300 = vmatprep.subr.mxu0 %v4481_v2  ;;  %4305 = vmatprep.subr.mxu1 %v4481_v2 }
  0x32   :  { %4293 = vmatmul.mubr.msk.f32.vlgmr.msra.gmra.mrb[22].mxu0 %vm240_vm0, %v46_v47  ;;  %4298 = vmatmul.mubr.msk.f32.vlgmr.msra.gmra.mrb[22].mxu1 %vm240_vm0, %v47_v48 }
  0x33   :  { %4302 = vmatprep.mubr.msk.f32.mxu0 %vm4482_vm1, %v4481_v2  ;;  %4307 = vmatprep.mubr.msk.f32.mxu1 %vm4482_vm1, %v4481_v2 }
  0xd8   :  { %v313_v49 = vpop.f32.mrb[0].mxu0  ;;  %v389_v50 = vpop.f32.mrb[0].mxu1 }
  0xd9   :  { %v4184_v51 = vpop.f32.mrb[1].mxu0  ;;  %v4189_v52 = vpop.f32.mrb[1].mxu1  ;;  %v314_v14 = vadd.f32 %v3979_v6, %v313_v49  ;;  %v390_v15 = vadd.f32 %v3980_v7, %v389_v50  ;;  %v3995_v50 = vld [vmem:[%s5080_s2 + $0x10] ss:$0 sm:$0xff]  ;;  %v2065_v7 = vld [vmem:[%s5081_s3] sm:$0xff] }
  0xda   :  { %v3996_v51 = vld [vmem:[%s5080_s2 + $0x11] ss:$0 sm:$0xff] }
  0xdc   :  { %v465_v53 = vpop.f32.mrb[2].mxu0  ;;  %v541_v54 = vpop.f32.mrb[2].mxu1 }
  0xdd   :  { %v4194_v55 = vpop.f32.mrb[3].mxu0  ;;  %v4199_v56 = vpop.f32.mrb[3].mxu1  ;;  %v466_v26 = vadd.f32 %v3981_v18, %v465_v53  ;;  %v542_v27 = vadd.f32 %v3982_v19, %v541_v54 }
  0xe0   :  { %v617_v57 = vpop.f32.mrb[4].mxu0  ;;  %v693_v58 = vpop.f32.mrb[4].mxu1 }
  0xe1   :  { %v4204_v59 = vpop.f32.mrb[5].mxu0  ;;  %v4209_v60 = vpop.f32.mrb[5].mxu1  ;;  %v618_v38 = vadd.f32 %v3983_v30, %v617_v57  ;;  %v694_v39 = vadd.f32 %v3984_v31, %v693_v58 }
  0xe4   :  { %v4791_v61 = vpop.f32.mrb[6].mxu0  ;;  %v4793_v62 = vpop.f32.mrb[6].mxu1 }
  0xe5   :  { %v4214_v63 = vpop.f32.mrb[7].mxu0  ;;  %v4219_v0 = vpop.f32.mrb[7].mxu1  ;;  %v770_v48 = vadd.f32 %v3985_v42, %v4791_v61  ;;  %v846_v49 = vadd.f32 %v3986_v43, %v4793_v62 }
  0xe8   :  { %v921_v4 = vpop.f32.mrb[8].mxu0  ;;  %v997_v5 = vpop.f32.mrb[8].mxu1 }
  0xe9   :  { %v922_v8 = vadd.f32 %v3987_v1, %v921_v4  ;;  %v998_v9 = vadd.f32 %v3988_v3, %v997_v5  ;;  %v4224_v10 = vpop.f32.mrb[9].mxu0  ;;  %v4229_v11 = vpop.f32.mrb[9].mxu1 }
  0xeb   :  { %4301 = vmatpush3.xpose.msk.msra.mxu0 %vm2073_vm2, %v922_v8  ;;  %4306 = vmatpush3.xpose.msk.msra.mxu1 %vm2073_vm2, %v998_v9  ;;  %v2066_v9 = vld [vmem:[%s5081_s3 + $0x8] sm:$0xff] }
  0xec   :  { %v1073_v16 = vpop.f32.mrb[10].mxu0  ;;  %v1149_v17 = vpop.f32.mrb[10].mxu1  ;;  %4310 = vmatprep.subr.mxu0 %v4481_v2  ;;  %4315 = vmatprep.subr.mxu1 %v4481_v2 }
  0xed   :  { %v1074_v20 = vadd.f32 %v3989_v12, %v1073_v16  ;;  %v1150_v21 = vadd.f32 %v3990_v13, %v1149_v17  ;;  %v4234_v22 = vpop.f32.mrb[11].mxu0  ;;  %v4239_v23 = vpop.f32.mrb[11].mxu1  ;;  %v2068_v17 = vld [vmem:[%s5081_s3 + $0x18] sm:$0xff] }
  0xee   :  { %4303 = vmatmul.mubr.msk.f32.vlgmr.msra.gmra.mrb[24].mxu0 %vm2073_vm2, %v314_v14  ;;  %4308 = vmatmul.mubr.msk.f32.vlgmr.msra.gmra.mrb[24].mxu1 %vm2073_vm2, %v390_v15  ;;  %v2067_v14 = vld [vmem:[%s5081_s3 + $0x10] sm:$0xff]  ;;  %v2069_v23 = vld [vmem:[%s5081_s3 + $0x20] sm:$0xff] }
  0xef   :  { %4311 = vmatpush3.xpose.msk.msra.mxu0 %vm2073_vm2, %v1074_v20  ;;  %4316 = vmatpush3.xpose.msk.msra.mxu1 %vm2073_vm2, %v1150_v21 }
  0xf0   :  { %v1225_v28 = vpop.f32.mrb[12].mxu0  ;;  %v1301_v29 = vpop.f32.mrb[12].mxu1  ;;  %4312 = vmatprep.mubr.msk.f32.mxu0 %vm4482_vm1, %v4481_v2  ;;  %4317 = vmatprep.mubr.msk.f32.mxu1 %vm4482_vm1, %v4481_v2 }
  0xf1   :  { %v1226_v32 = vadd.f32 %v3991_v24, %v1225_v28  ;;  %v1302_v33 = vadd.f32 %v3992_v25, %v1301_v29  ;;  %4320 = vmatprep.subr.mxu0 %v4481_v2  ;;  %4325 = vmatprep.subr.mxu1 %v4481_v2  ;;  %v4244_v34 = vpop.f32.mrb[13].mxu0  ;;  %v4249_v35 = vpop.f32.mrb[13].mxu1 }
  0xf2   :  { %4313 = vmatmul.mubr.msk.f32.vlgmr.msra.gmra.mrb[26].mxu0 %vm2073_vm2, %v466_v26  ;;  %4318 = vmatmul.mubr.msk.f32.vlgmr.msra.gmra.mrb[26].mxu1 %vm2073_vm2, %v542_v27  ;;  %v2070_v27 = vld [vmem:[%s5081_s3 + $0x28] sm:$0xff] }
  0xf3   :  { %4321 = vmatpush3.xpose.msk.msra.mxu0 %vm2073_vm2, %v1226_v32  ;;  %4326 = vmatpush3.xpose.msk.msra.mxu1 %vm2073_vm2, %v1302_v33  ;;  %v2071_v33 = vld [vmem:[%s5081_s3 + $0x30] sm:$0xff] }
  0xf4   :  { %v1377_v40 = vpop.f32.mrb[14].mxu0  ;;  %v1453_v41 = vpop.f32.mrb[14].mxu1  ;;  %4322 = vmatprep.mubr.msk.f32.mxu0 %vm4482_vm1, %v4481_v2  ;;  %4327 = vmatprep.mubr.msk.f32.mxu1 %vm4482_vm1, %v4481_v2 }
  0xf5   :  { %v1378_v44 = vadd.f32 %v3993_v36, %v1377_v40  ;;  %v1454_v45 = vadd.f32 %v3994_v37, %v1453_v41  ;;  %4330 = vmatprep.subr.mxu0 %v4481_v2  ;;  %4335 = vmatprep.subr.mxu1 %v4481_v2  ;;  %v4254_v46 = vpop.f32.mrb[15].mxu0  ;;  %v4259_v47 = vpop.f32.mrb[15].mxu1  ;;  %v2072_v37 = vld [vmem:[%s5081_s3 + $0x38] sm:$0xff] }
  0xf6   :  { %4323 = vmatmul.mubr.msk.f32.vlgmr.msra.gmra.mrb[28].mxu0 %vm2073_vm2, %v618_v38  ;;  %4328 = vmatmul.mubr.msk.f32.vlgmr.msra.gmra.mrb[28].mxu1 %vm2073_vm2, %v694_v39 }
  0xf7   :  { %4331 = vmatpush3.xpose.msk.msra.mxu0 %vm2073_vm2, %v1378_v44  ;;  %4336 = vmatpush3.xpose.msk.msra.mxu1 %vm2073_vm2, %v1454_v45 }
  0xf8   :  { %4332 = vmatprep.mubr.msk.f32.mxu0 %vm4482_vm1, %v4481_v2  ;;  %4337 = vmatprep.mubr.msk.f32.mxu1 %vm4482_vm1, %v4481_v2 }
  0xf9   :  { %4340 = vmatprep.subr.mxu0 %v4481_v2  ;;  %4345 = vmatprep.subr.mxu1 %v4481_v2  ;;  %v1529_v52 = vpop.f32.mrb[16].mxu0  ;;  %v1605_v55 = vpop.f32.mrb[16].mxu1 }
  0xfa   :  { %4333 = vmatmul.mubr.msk.f32.vlgmr.msra.gmra.mrb[30].mxu0 %vm2073_vm2, %v770_v48  ;;  %4338 = vmatmul.mubr.msk.f32.vlgmr.msra.gmra.mrb[30].mxu1 %vm2073_vm2, %v846_v49  ;;  %v1530_v53 = vadd.f32 %v3995_v50, %v1529_v52  ;;  %v4264_v54 = vpop.f32.mrb[17].mxu0  ;;  %v1606_v56 = vadd.f32 %v3996_v51, %v1605_v55  ;;  %v4269_v57 = vpop.f32.mrb[17].mxu1 }
  0xfb   :  { %4342 = vmatprep.mubr.msk.f32.mxu0 %vm4482_vm1, %v4481_v2  ;;  %4347 = vmatprep.mubr.msk.f32.mxu1 %vm4482_vm1, %v4481_v2 }
  0xfc   :  { %4341 = vmatpush3.msra.mxu0 %v1530_v53  ;;  %4346 = vmatpush3.msra.mxu1 %v1606_v56 }
  0xfd   :  { %v4891_v58 = vpop.f32.mrb[18].mxu0  ;;  %4350 = vmatprep.subr.mxu0 %v4481_v2  ;;  %v4894_v60 = vpop.f32.mrb[18].mxu1  ;;  %4355 = vmatprep.subr.mxu1 %v4481_v2 }
  0xfe   :  { %v4274_v59 = vpop.f32.mrb[19].mxu0  ;;  %v4279_v61 = vpop.f32.mrb[19].mxu1 }
 0x101   :  { %v4897_v62 = vpop.f32.mrb[20].mxu0  ;;  %v4899_v0 = vpop.f32.mrb[20].mxu1 }
 0x102   :  { %v4284_v63 = vpop.f32.mrb[21].mxu0  ;;  %v4289_v1 = vpop.f32.mrb[21].mxu1 }
 0x105   :  { %v4901_v3 = vpop.f32.mrb[22].mxu0  ;;  %v4903_v5 = vpop.f32.mrb[22].mxu1 }
 0x106   :  { %v4294_v4 = vpop.f32.mrb[23].mxu0  ;;  %v4299_v6 = vpop.f32.mrb[23].mxu1 }
 0x1c1   :  { %v2146_v8 = vpop.f32.mrb[24].mxu0  ;;  %v2222_v10 = vpop.f32.mrb[24].mxu1 }
 0x1c2   :  { %v2147_v11 = vadd.f32 %v2146_v8, %v2065_v7  ;;  %v4304_v12 = vpop.f32.mrb[25].mxu0  ;;  %v4309_v13 = vpop.f32.mrb[25].mxu1  ;;  %v2223_v15 = vadd.f32 %v2222_v10, %v2066_v9 }
 0x1c4   :  { %v2682_v16 = vsel %vm2073_vm2, %v2147_v11, -inf  ;;  %v2685_v25 = vsel %vm2073_vm2, %v2223_v15, -inf }
 0x1c5   :  { %v2374_v18 = vpop.f32.mrb[26].mxu1  ;;  %2683 = vmax.xlane.f32.xlu0 %v2682_v16  ;;  %v2298_v19 = vpop.f32.mrb[26].mxu0 }
 0x1c6   :  { %v2299_v20 = vadd.f32 %v2298_v19, %v2067_v14  ;;  %v4314_v21 = vpop.f32.mrb[27].mxu0  ;;  %v4319_v22 = vpop.f32.mrb[27].mxu1  ;;  %v2375_v24 = vadd.f32 %v2374_v18, %v2068_v17 }
 0x1c8   :  { %v2688_v26 = vsel %vm2073_vm2, %v2299_v20, -inf  ;;  %v2691_v35 = vsel %vm2073_vm2, %v2375_v24, -inf }
 0x1c9   :  { %v2526_v28 = vpop.f32.mrb[28].mxu1  ;;  %2686 = vmax.xlane.f32.xlu0 %v2685_v25  ;;  %2689 = vmax.xlane.f32.xlu1 %v2688_v26  ;;  %v2450_v29 = vpop.f32.mrb[28].mxu0 }
 0x1ca   :  { %v2451_v30 = vadd.f32 %v2450_v29, %v2069_v23  ;;  %v4324_v31 = vpop.f32.mrb[29].mxu0  ;;  %v4329_v32 = vpop.f32.mrb[29].mxu1  ;;  %v2527_v34 = vadd.f32 %v2526_v28, %v2070_v27 }
 0x1cc   :  { %v2694_v36 = vsel %vm2073_vm2, %v2451_v30, -inf  ;;  %v2697_v44 = vsel %vm2073_vm2, %v2527_v34, -inf }
 0x1cd   :  { %v2678_v38 = vpop.f32.mrb[30].mxu1  ;;  %2692 = vmax.xlane.f32.xlu1 %v2691_v35  ;;  %2695 = vmax.xlane.f32.xlu0 %v2694_v36  ;;  %v2602_v39 = vpop.f32.mrb[30].mxu0  ;;  %v3997_v35 = vld [vmem:[%s5080_s2 + $0x12] ss:$0 sm:$0xff] }
 0x1ce   :  { %v2603_v40 = vadd.f32 %v2602_v39, %v2071_v33  ;;  %v4334_v41 = vpop.f32.mrb[31].mxu0  ;;  %v4339_v42 = vpop.f32.mrb[31].mxu1  ;;  %v2679_v43 = vadd.f32 %v2678_v38, %v2072_v37  ;;  %v1682_v39 = vadd.f32 %v3997_v35, %v4891_v58 }
 0x1cf   :  { %v3998_v41 = vld [vmem:[%s5080_s2 + $0x13] ss:$0 sm:$0xff] }
 0x1d0   :  { %v2700_v45 = vsel %vm2073_vm2, %v2603_v40, -inf  ;;  %v2703_v46 = vsel %vm2073_vm2, %v2679_v43, -inf }
 0x1d1   :  { %2698 = vmax.xlane.f32.xlu1 %v2697_v44  ;;  %2701 = vmax.xlane.f32.xlu0 %v2700_v45 }
 0x1d5   :  { %2704 = vmax.xlane.f32.xlu1 %v2703_v46  ;;  %v1758_v46 = vadd.f32 %v3998_v41, %v4894_v60 }
 0x252   :  { %v2684_v47 = vpop.xlane.xlu0 %2683 }
 0x253   :  { %v2706_v48 = vsub.f32 %v2147_v11, %v2684_v47 }
 0x255   :  { %v2714_v49 = vmul.f32 1.442695, %v2706_v48 }
 0x256   :  { %v2687_v50 = vpop.xlane.xlu0 %2686  ;;  %v2690_v51 = vpop.xlane.xlu1 %2689 }
 0x257   :  { %4425 = vpow2.f32 %v2714_v49  ;;  %v2707_v52 = vsub.f32 %v2223_v15, %v2687_v50  ;;  %v2708_v53 = vsub.f32 %v2299_v20, %v2690_v51  ;;  %v4000_v49 = vld [vmem:[%s5080_s2 + $0x15] ss:$0 sm:$0xff]  ;;  %v4001_v51 = vld [vmem:[%s5080_s2 + $0x16] ss:$0 sm:$0xff] }
 0x259   :  { %v2716_v54 = vmul.f32 1.442695, %v2707_v52  ;;  %v2718_v55 = vmul.f32 1.442695, %v2708_v53 }
 0x25a   :  { %v2693_v56 = vpop.xlane.xlu1 %2692  ;;  %v2696_v57 = vpop.xlane.xlu0 %2695 }
 0x25b   :  { %4427 = vpow2.f32 %v2716_v54  ;;  %v2709_v59 = vsub.f32 %v2375_v24, %v2693_v56  ;;  %v2710_v61 = vsub.f32 %v2451_v30, %v2696_v57  ;;  %v1986_v54 = vadd.f32 %v4001_v51, %v4901_v3 }
 0x25c   :  { %4429 = vpow2.f32 %v2718_v55  ;;  %v4002_v55 = vld [vmem:[%s5080_s2 + $0x17] ss:$0 sm:$0xff] }
 0x25d   :  { %v2720_v63 = vmul.f32 1.442695, %v2709_v59  ;;  %v2722_v1 = vmul.f32 1.442695, %v2710_v61  ;;  %v2062_v3 = vadd.f32 %v4002_v55, %v4903_v5  ;;  %v3354_v5 = vld [vmem:[%s5082_s4] sm:$0xff] }
 0x25e   :  { %v2699_v4 = vpop.xlane.xlu1 %2698  ;;  %v2702_v6 = vpop.xlane.xlu0 %2701 }
 0x25f   :  { %4431 = vpow2.f32 %v2720_v63  ;;  %v2711_v7 = vsub.f32 %v2527_v34, %v2699_v4  ;;  %v2712_v8 = vsub.f32 %v2603_v40, %v2702_v6  ;;  %v3356_v4 = vld [vmem:[%s5082_s4 + $0x10] sm:$0xff] }
 0x260   :  { %4433 = vpow2.f32 %v2722_v1  ;;  %v3355_v1 = vld [vmem:[%s5082_s4 + $0x8] sm:$0xff] }
 0x261   :  { %v4426_v9 = vpop.eup %4425  ;;  %v2724_v10 = vmul.f32 1.442695, %v2711_v7  ;;  %v2726_v11 = vmul.f32 1.442695, %v2712_v8  ;;  %v3357_v8 = vld [vmem:[%s5082_s4 + $0x18] sm:$0xff] }
 0x262   :  { %v2705_v12 = vpop.xlane.xlu1 %2704  ;;  %v2730_v13 = vsel %vm2073_vm2, %v4426_v9, 0.0 }
 0x263   :  { %4435 = vpow2.f32 %v2724_v10  ;;  %v2713_v14 = vsub.f32 %v2679_v43, %v2705_v12  ;;  %2731 = vadd.xlane.f32.xlu0 %v2730_v13  ;;  %v3999_v43 = vld [vmem:[%s5080_s2 + $0x14] ss:$0 sm:$0xff]  ;;  %v3358_v10 = vld [vmem:[%s5082_s4 + $0x20] sm:$0xff] }
 0x264   :  { %4437 = vpow2.f32 %v2726_v11  ;;  %v1834_v48 = vadd.f32 %v3999_v43, %v4897_v62  ;;  %v1910_v62 = vadd.f32 %v4000_v49, %v4899_v0 }
 0x265   :  { %v4428_v15 = vpop.eup %4427  ;;  %v2728_v16 = vmul.f32 1.442695, %v2713_v14  ;;  %v3359_v14 = vld [vmem:[%s5082_s4 + $0x28] sm:$0xff] }
 0x266   :  { %v4430_v17 = vpop.eup %4429  ;;  %v2733_v18 = vsel %vm2073_vm2, %v4428_v15, 0.0 }
 0x267   :  { %4439 = vpow2.f32 %v2728_v16  ;;  %2734 = vadd.xlane.f32.xlu1 %v2733_v18  ;;  %v2736_v19 = vsel %vm2073_vm2, %v4430_v17, 0.0  ;;  %v3360_v16 = vld [vmem:[%s5082_s4 + $0x30] sm:$0xff] }
 0x268   :  { %2737 = vadd.xlane.f32.xlu0 %v2736_v19 }
 0x269   :  { %v4432_v20 = vpop.eup %4431 }
 0x26a   :  { %v4434_v21 = vpop.eup %4433  ;;  %v2739_v22 = vsel %vm2073_vm2, %v4432_v20, 0.0 }
 0x26b   :  { %2740 = vadd.xlane.f32.xlu1 %v2739_v22  ;;  %v2742_v23 = vsel %vm2073_vm2, %v4434_v21, 0.0 }
 0x26c   :  { %2743 = vadd.xlane.f32.xlu0 %v2742_v23 }
 0x26d   :  { %v4942_v24 = vpop.eup %4435 }
 0x26e   :  { %v4944_v25 = vpop.eup %4437  ;;  %v2745_v26 = vsel %vm2073_vm2, %v4942_v24, 0.0 }
 0x26f   :  { %2746 = vadd.xlane.f32.xlu1 %v2745_v26  ;;  %v2748_v27 = vsel %vm2073_vm2, %v4944_v25, 0.0 }
 0x270   :  { %2749 = vadd.xlane.f32.xlu0 %v2748_v27 }
 0x271   :  { %v4950_v28 = vpop.eup %4439 }
 0x272   :  { %v2751_v29 = vsel %vm2073_vm2, %v4950_v28, 0.0 }
 0x273   :  { %2752 = vadd.xlane.f32.xlu1 %v2751_v29 }
 0x2f0   :  { %v2732_v30 = vpop.xlane.xlu0 %2731 }
 0x2f1   :  { %4441 = vrcp.f32 %v2732_v30 }
 0x2f4   :  { %v2735_v31 = vpop.xlane.xlu1 %2734 }
 0x2f5   :  { %4443 = vrcp.f32 %v2735_v31  ;;  %v2738_v32 = vpop.xlane.xlu0 %2737 }
 0x2f6   :  { %4445 = vrcp.f32 %v2738_v32 }
 0x2f8   :  { %v2741_v33 = vpop.xlane.xlu1 %2740 }
 0x2f9   :  { %4447 = vrcp.f32 %v2741_v33  ;;  %v2744_v34 = vpop.xlane.xlu0 %2743 }
 0x2fa   :  { %4449 = vrcp.f32 %v2744_v34 }
 0x2fb   :  { %v4442_v36 = vpop.eup %4441 }
 0x2fc   :  { %v2755_v37 = vmul.f32 %v4442_v36, %v4426_v9  ;;  %v2747_v38 = vpop.xlane.xlu1 %2746 }
 0x2fd   :  { %4451 = vrcp.f32 %v2747_v38  ;;  %v2750_v40 = vpop.xlane.xlu0 %2749 }
 0x2fe   :  { %4453 = vrcp.f32 %v2750_v40  ;;  %4343 = vmatmul.mubr.msk.f32.vlgmr.msra.gmra.mrb[32].mxu0 %vm2073_vm2, %v2755_v37 }
 0x2ff   :  { %v4444_v42 = vpop.eup %4443  ;;  %4351 = vmatpush3.msra.mxu0 %v1682_v39  ;;  %4352 = vmatprep.mubr.msk.f32.mxu0 %vm4482_vm1, %v4481_v2 }
 0x300   :  { %v4446_v44 = vpop.eup %4445  ;;  %v2757_v58 = vmul.f32 %v4444_v42, %v4428_v15  ;;  %v2753_v45 = vpop.xlane.xlu1 %2752  ;;  %4360 = vmatprep.subr.mxu0 %v4481_v2  ;;  %v4083_v42 = vld [vmem:[%s5083_s5] ss:$0 sm:$0xff] }
 0x301   :  { %v2759_v47 = vmul.f32 %v4446_v44, %v4430_v17  ;;  %4455 = vrcp.f32 %v2753_v45 }
 0x302   :  { %4348 = vmatmul.mubr.msk.f32.vlgmr.msra.gmra.mrb[32].mxu1 %vm2073_vm2, %v2757_v58 }
 0x303   :  { %v4448_v50 = vpop.eup %4447  ;;  %4353 = vmatmul.mubr.msk.f32.vlgmr.msra.gmra.mrb[34].mxu0 %vm2073_vm2, %v2759_v47  ;;  %4356 = vmatpush3.msra.mxu1 %v1758_v46 }
 0x304   :  { %v4450_v52 = vpop.eup %4449  ;;  %v2761_v60 = vmul.f32 %v4448_v50, %v4432_v20  ;;  %4361 = vmatpush3.msra.mxu0 %v1834_v48  ;;  %4357 = vmatprep.mubr.msk.f32.mxu1 %vm4482_vm1, %v4481_v2  ;;  %v3361_v20 = vld [vmem:[%s5082_s4 + $0x38] sm:$0xff] }
 0x305   :  { %v2763_v53 = vmul.f32 %v4450_v52, %v4434_v21  ;;  %4362 = vmatprep.mubr.msk.f32.mxu0 %vm4482_vm1, %v4481_v2  ;;  %4365 = vmatprep.subr.mxu1 %v4481_v2 }
 0x306   :  { %4370 = vmatprep.subr.mxu0 %v4481_v2  ;;  %4358 = vmatmul.mubr.msk.f32.vlgmr.msra.gmra.mrb[34].mxu1 %vm2073_vm2, %v2761_v60 }
 0x307   :  { %v4452_v56 = vpop.eup %4451  ;;  %4363 = vmatmul.mubr.msk.f32.vlgmr.msra.gmra.mrb[36].mxu0 %vm2073_vm2, %v2763_v53  ;;  %4366 = vmatpush3.msra.mxu1 %v1910_v62 }
 0x308   :  { %v4454_v0 = vpop.eup %4453  ;;  %v2765_v57 = vmul.f32 %v4452_v56, %v4942_v24  ;;  %4371 = vmatpush3.msra.mxu0 %v1986_v54  ;;  %4367 = vmatprep.mubr.msk.f32.mxu1 %vm4482_vm1, %v4481_v2 }
 0x309   :  { %v2767_v59 = vmul.f32 %v4454_v0, %v4944_v25  ;;  %4372 = vmatprep.mubr.msk.f32.mxu0 %vm4482_vm1, %v4481_v2  ;;  %4375 = vmatprep.subr.mxu1 %v4481_v2 }
 0x30a   :  { %4368 = vmatmul.mubr.msk.f32.vlgmr.msra.gmra.mrb[36].mxu1 %vm2073_vm2, %v2765_v57  ;;  %4380 = vmatprep.subr.mxu0 %v4481_v2 }
 0x30b   :  { %v4456_v61 = vpop.eup %4455  ;;  %4373 = vmatmul.mubr.msk.f32.vlgmr.msra.gmra.mrb[38].mxu0 %vm2073_vm2, %v2767_v59  ;;  %4376 = vmatpush3.msra.mxu1 %v2062_v3 }
 0x30c   :  { %v2769_v63 = vmul.f32 %v4456_v61, %v4950_v28  ;;  %4377 = vmatprep.mubr.msk.f32.mxu1 %vm4482_vm1, %v4481_v2  ;;  %4382 = vmatprep.mubr.msk.f32.mxu0 %vm4482_vm1, %v4481_v2 }
 0x30d   :  { %4385 = vmatprep.subr.mxu1 %v4481_v2  ;;  %4381 = vmatpush3.msra.mxu0 %v3354_v5 }
 0x30e   :  { %4378 = vmatmul.mubr.msk.f32.vlgmr.msra.gmra.mrb[38].mxu1 %vm2073_vm2, %v2769_v63  ;;  %4390 = vmatprep.subr.mxu0 %v4481_v2 }
 0x30f   :  { %4387 = vmatprep.mubr.msk.f32.mxu1 %vm4482_vm1, %v4481_v2  ;;  %4386 = vmatpush3.msra.mxu1 %v3355_v1 }
 0x310   :  { %4395 = vmatprep.subr.mxu1 %v4481_v2 }
 0x3d1   :  { %v2839_v6 = vpop.f32.mrb[32].mxu0 }
 0x3d2   :  { %v4344_v7 = vpop.f32.mrb[33].mxu0  ;;  %4383 = vmatmul.mubr.msk.f32.vlgmr.msra.gmra.mrb[40].mxu0 %vm2073_vm2, %v2839_v6 }
 0x3d3   :  { %4391 = vmatpush3.msra.mxu0 %v3356_v4  ;;  %4392 = vmatprep.mubr.msk.f32.mxu0 %vm4482_vm1, %v4481_v2 }
 0x3d4   :  { %4400 = vmatprep.subr.mxu0 %v4481_v2 }
 0x3d5   :  { %v2912_v9 = vpop.f32.mrb[32].mxu1 }
 0x3d6   :  { %v2985_v11 = vpop.f32.mrb[34].mxu0  ;;  %v4349_v12 = vpop.f32.mrb[33].mxu1  ;;  %4388 = vmatmul.mubr.msk.f32.vlgmr.msra.gmra.mrb[40].mxu1 %vm2073_vm2, %v2912_v9 }
 0x3d7   :  { %v4354_v13 = vpop.f32.mrb[35].mxu0  ;;  %4393 = vmatmul.mubr.msk.f32.vlgmr.msra.gmra.mrb[42].mxu0 %vm2073_vm2, %v2985_v11  ;;  %4396 = vmatpush3.msra.mxu1 %v3357_v8 }
 0x3d8   :  { %4397 = vmatprep.mubr.msk.f32.mxu1 %vm4482_vm1, %v4481_v2  ;;  %4401 = vmatpush3.msra.mxu0 %v3358_v10 }
 0x3d9   :  { %v3058_v15 = vpop.f32.mrb[34].mxu1  ;;  %4402 = vmatprep.mubr.msk.f32.mxu0 %vm4482_vm1, %v4481_v2  ;;  %4405 = vmatprep.subr.mxu1 %v4481_v2 }
 0x3da   :  { %v3131_v17 = vpop.f32.mrb[36].mxu0  ;;  %v4359_v18 = vpop.f32.mrb[35].mxu1  ;;  %4398 = vmatmul.mubr.msk.f32.vlgmr.msra.gmra.mrb[42].mxu1 %vm2073_vm2, %v3058_v15  ;;  %4410 = vmatprep.subr.mxu0 %v4481_v2 }
 0x3db   :  { %v4364_v19 = vpop.f32.mrb[37].mxu0  ;;  %4403 = vmatmul.mubr.msk.f32.vlgmr.msra.gmra.mrb[44].mxu0 %vm2073_vm2, %v3131_v17  ;;  %4406 = vmatpush3.msra.mxu1 %v3359_v14 }
 0x3dc   :  { %4407 = vmatprep.mubr.msk.f32.mxu1 %vm4482_vm1, %v4481_v2  ;;  %4411 = vmatpush3.msra.mxu0 %v3360_v16 }
 0x3dd   :  { %v3204_v21 = vpop.f32.mrb[36].mxu1  ;;  %4412 = vmatprep.mubr.msk.f32.mxu0 %vm4482_vm1, %v4481_v2  ;;  %4415 = vmatprep.subr.mxu1 %v4481_v2 }
 0x3de   :  { %v3277_v22 = vpop.f32.mrb[38].mxu0  ;;  %v4369_v23 = vpop.f32.mrb[37].mxu1  ;;  %4408 = vmatmul.mubr.msk.f32.vlgmr.msra.gmra.mrb[44].mxu1 %vm2073_vm2, %v3204_v21 }
 0x3df   :  { %v4374_v24 = vpop.f32.mrb[39].mxu0  ;;  %4413 = vmatmul.mubr.msk.f32.vlgmr.msra.gmra.mrb[46].mxu0 %vm2073_vm2, %v3277_v22  ;;  %4416 = vmatpush3.msra.mxu1 %v3361_v20 }
 0x3e0   :  { %4417 = vmatprep.mubr.msk.f32.mxu1 %vm4482_vm1, %v4481_v2 }
 0x3e1   :  { %v3350_v25 = vpop.f32.mrb[38].mxu1 }
 0x3e2   :  { %v4379_v26 = vpop.f32.mrb[39].mxu1  ;;  %4418 = vmatmul.mubr.msk.f32.vlgmr.msra.gmra.mrb[46].mxu1 %vm2073_vm2, %v3350_v25 }
 0x4a5   :  { %v3431_v27 = vpop.f32.mrb[40].mxu0 }
 0x4a6   :  { %v4384_v28 = vpop.f32.mrb[41].mxu0 }
 0x4a9   :  { %v3504_v29 = vpop.f32.mrb[40].mxu1 }
 0x4aa   :  { %v3577_v30 = vpop.f32.mrb[42].mxu0  ;;  %v4389_v31 = vpop.f32.mrb[41].mxu1 }
 0x4ab   :  { %v3946_v32 = vadd.f32 %v3577_v30, %v3431_v27  ;;  %v4394_v33 = vpop.f32.mrb[43].mxu0 }
 0x4ad   :  { %v3650_v34 = vpop.f32.mrb[42].mxu1 }
 0x4ae   :  { %v3947_v35 = vadd.f32 %v3650_v34, %v3504_v29  ;;  %v3723_v36 = vpop.f32.mrb[44].mxu0  ;;  %v4399_v37 = vpop.f32.mrb[43].mxu1 }
 0x4af   :  { %v3948_v38 = vadd.f32 %v3946_v32, %v3723_v36  ;;  %v4404_v39 = vpop.f32.mrb[45].mxu0 }
 0x4b1   :  { %v3796_v40 = vpop.f32.mrb[44].mxu1 }
 0x4b2   :  { %v3949_v41 = vadd.f32 %v3947_v35, %v3796_v40  ;;  %v3869_v2 = vpop.f32.mrb[46].mxu0  ;;  %v4409_v43 = vpop.f32.mrb[45].mxu1 }
 0x4b3   :  { %v3950_v44 = vadd.f32 %v3948_v38, %v3869_v2  ;;  %v4414_v58 = vpop.f32.mrb[47].mxu0 }
 0x4b5   :  { %v3959_v45 = vadd.f32 %v4083_v42, %v3950_v44  ;;  %v3942_v46 = vpop.f32.mrb[46].mxu1 }
 0x4b6   :  { %v3951_v47 = vadd.f32 %v3949_v41, %v3942_v46  ;;  %v4419_v48 = vpop.f32.mrb[47].mxu1 }
 0x4b7   :  { %3961 = vst.msk [vmem:[#allocation2] sm:$0xff] %vm240_vm0, %v3959_v45 }
 0x4b8   :  { %v3960_v49 = vadd.f32 %v4083_v42, %v3951_v47 }
 0x4ba   :  { %3962 = vst.msk [vmem:[#allocation2 + $0x8] sm:$0xff] %vm240_vm0, %v3960_v49 }
 0x4bb   :  { %4468 = shalt.err (!%p4465_p4)
}
 0x4bc   :  { %s4469_s23 = scalar_lea.hbm %s5084_s6, 256 }
 0x4bd   :  { %p4470_p5 = scmp.ne.s32.totalorder %s5084_s6, %s4469_s23  ;;  %p4473_p6 = scmp.lt.u32.totalorder %s4469_s23, %s5084_s6 }
 0x4bf   :  { %p4475_p7 = pnand %p4473_p6, %p4470_p5 }
 0x4c1   :  { %4478 = shalt.err (!%p4475_p7)
}
 0x4c2   :  { %s4484_s28 = smov 128   ;;  %s4485_s29 = smov 8  }
 0x4c3   :  { %3974 = dma.vmem_to_hbm [thread:$0]  %s3969_s1, 256, %s5084_s6, [#allocation3], %s4484_s28, %s4484_s28, %s4485_s29  }
 0x4c4   :  { %4479 = dma.done.wait [#allocation3], 256  }
 0x4c5   :  { %4480 = vsyncadd [#allocation3], 4294967040 }
 0x4c6   :  { %3978 = vsyncpa [#allocation3], 1 }

</bundles_post_ra>
